<compile_context>
chip_gen: v6e
topology: v6e:2x2x1
jax: 0.10.0
libtpu: 0.0.40
codegen_flags: <defaults>
</compile_context>

<pallas_src>
import jax
import jax.numpy as jnp
from jax.experimental import pallas as pl
from jax.experimental.pallas import tpu as pltpu

MARGIN = 1.0
ALPHA = 0.1
COS_EPS = 1e-6

_MAX_BLOCK_ROWS = 1024
_NUM_PIPELINE_BUFFERS = 2       # BlockSpec default double-buffering
_NUM_F32_INTERMEDIATES = 6      # a, p, n (f32 upcast), ap, an, product temp


def _physical_vmem_bytes():
    """Per-core VMEM capacity; conservative 64 MiB fallback (v7x-sized)."""
    try:
        info = pltpu.get_tpu_info()
        for attr in ("vmem_capacity_bytes", "vmem_bytes", "vmem_size_bytes"):
            v = getattr(info, attr, None)
            if v:
                return int(v)
    except Exception:
        pass
    return 64 * 1024 * 1024


def _plan_tile(B, D, in_dtype, block_rows=None):
    """Pick (row_tile, vmem_limit_bytes) from actual per-row VMEM usage."""
    physical = _physical_vmem_bytes()
    vmem_limit = int(physical * 3 // 4)            # leave headroom below physical
    work_budget = int(vmem_limit * 3 // 4)         # slack for outputs/compiler scratch

    itemsize = int(jnp.dtype(in_dtype).itemsize)
    sublane = max(8, 32 // max(itemsize, 1))       # 8 f32 / 16 bf16 / 32 int8

    dma_per_row = 3 * _NUM_PIPELINE_BUFFERS * D * itemsize   # streamed inputs
    work_per_row = _NUM_F32_INTERMEDIATES * D * 4            # f32 working set

    rows = work_budget // max(dma_per_row + work_per_row, 1)
    rows = max((rows // sublane) * sublane, sublane)
    rows = min(rows, _MAX_BLOCK_ROWS)

    if block_rows is not None:                     # explicit override (tests)
        rows = max((int(block_rows) // sublane) * sublane, sublane)

    tile = B if B <= rows else rows                # full-array block when small
    return int(tile), int(vmem_limit)


def _triplet_stream_kernel(a_ref, p_ref, n_ref, diff_ref, cos_ref):
    """Per-tile pass: emit (dp - dn) and cosine similarity for each sample."""
    a = a_ref[...].astype(jnp.float32)             # (tile, D)
    p = p_ref[...].astype(jnp.float32)
    n = n_ref[...].astype(jnp.float32)

    ap = a - p                                     # = -(p - a)
    an = a - n                                     # = -(n - a)

    dp = jnp.sum(ap * ap, axis=1)                  # (tile,) == ||p-a||^2
    dn = jnp.sum(an * an, axis=1)                  # (tile,) == ||n-a||^2
    dot = jnp.sum(ap * an, axis=1)                 # (tile,) == (n-a).(p-a)

    tile = dp.shape[0]
    # cos = dot / max(sqrt(dp)*sqrt(dn), eps) == dot * rsqrt(max(dp*dn, eps^2))
    inv = jax.lax.rsqrt(
        jnp.maximum(dp * dn, jnp.float32(COS_EPS) * jnp.float32(COS_EPS)))

    # Lane-dense stores: (1, 1, tile) row blocks instead of (tile, 1) columns.
    diff_ref[...] = (dp - dn).reshape(1, 1, tile)
    cos_ref[...] = (dot * inv).reshape(1, 1, tile)


def triplet_loss(anchor, positive, negative, margin=MARGIN, alpha=ALPHA,
                 size_average=True, block_rows=None):
    """Pallas TPU implementation of TripletLoss.forward (returns a scalar).

    size_average is ignored, same as the reference module (always .mean()).
    """
    B, D = anchor.shape
    tile, vmem_limit = _plan_tile(B, D, anchor.dtype, block_rows)
    nb = pl.cdiv(B, tile)                          # ragged tail handled by Pallas

    diff, cos = pl.pallas_call(
        _triplet_stream_kernel,
        out_shape=(jax.ShapeDtypeStruct((nb, 1, tile), jnp.float32),
                   jax.ShapeDtypeStruct((nb, 1, tile), jnp.float32)),
        grid=(nb,),
        in_specs=[
            pl.BlockSpec((tile, D), lambda i: (i, 0)),
            pl.BlockSpec((tile, D), lambda i: (i, 0)),
            pl.BlockSpec((tile, D), lambda i: (i, 0)),
        ],
        out_specs=(
            pl.BlockSpec((1, 1, tile), lambda i: (i, 0, 0)),
            pl.BlockSpec((1, 1, tile), lambda i: (i, 0, 0)),
        ),
        compiler_params=pltpu.CompilerParams(
            dimension_semantics=(pltpu.PARALLEL,),
            vmem_limit_bytes=vmem_limit),
    )(anchor, positive, negative)

    # Finalize on tiny (B,) vectors in plain JAX: cos_reg couples all samples
    # through the relu, so it cannot be fused per-tile.  Slice the ragged tail
    # off BEFORE the cos sum so undefined rows never feed cos_reg.
    diff = diff.reshape(-1)[:B]
    cos_reg = jnp.sum(cos.reshape(-1)[:B])
    losses = jnp.maximum(
        diff + jnp.float32(margin) - jnp.float32(alpha) * cos_reg, 0.0)
    return jnp.mean(losses)


def _triplet_loss_ref(anchor, positive, negative, margin=MARGIN, alpha=ALPHA):
    """Pure-JAX reference mirroring the PyTorch module, for validation."""
    dp = jnp.sum((anchor - positive) ** 2, axis=1)
    dn = jnp.sum((anchor - negative) ** 2, axis=1)
    d1 = negative - anchor
    d2 = positive - anchor
    cos = jnp.sum(d1 * d2, axis=1) / jnp.maximum(
        jnp.linalg.norm(d1, axis=1) * jnp.linalg.norm(d2, axis=1), COS_EPS)
    cos_reg = jnp.sum(cos)
    losses = jax.nn.relu(dp - dn + margin - alpha * cos_reg)
    return jnp.mean(losses)


if __name__ == "__main__":
    key = jax.random.PRNGKey(0)

    # Case 1: small problem -> single full-array block (matches module usage).
    B, D = 8, 32
    ka, kp, kn = jax.random.split(key, 3)
    anchor = jax.random.normal(ka, (B, D), dtype=jnp.float32)
    positive = jax.random.normal(kp, (B, D), dtype=jnp.float32)
    negative = jax.random.normal(kn, (B, D), dtype=jnp.float32)

    loss = jax.block_until_ready(triplet_loss(anchor, positive, negative))
    ref = _triplet_loss_ref(anchor, positive, negative)
    assert jnp.allclose(loss, ref, rtol=1e-4, atol=1e-5), (loss, ref)

    # Case 2: ragged streaming path without any input padding.
    # B=40 with a forced 16-row tile -> grid=(3,), uneven last block; the
    # undefined tail rows are sliced off before the cos_reg sum.
    B2, D2 = 40, 128
    _, k1, k2, k3 = jax.random.split(key, 4)
    a2 = jax.random.normal(k1, (B2, D2), dtype=jnp.float32)
    p2 = jax.random.normal(k2, (B2, D2), dtype=jnp.float32)
    n2 = jax.random.normal(k3, (B2, D2), dtype=jnp.float32)

    loss2 = jax.block_until_ready(triplet_loss(a2, p2, n2, block_rows=16))
    ref2 = _triplet_loss_ref(a2, p2, n2)
    assert jnp.allclose(loss2, ref2, rtol=1e-4, atol=1e-5), (loss2, ref2)

    print("KERNEL_OK")
</pallas_src>

<mosaic_0001>
module attributes {stable_mosaic.version = 11 : i64} {
  func.func @_triplet_stream_kernel(%arg0: i32, %arg1: memref<8x32xf32, #tpu.memory_space<vmem>>, %arg2: memref<8x32xf32, #tpu.memory_space<vmem>>, %arg3: memref<8x32xf32, #tpu.memory_space<vmem>>, %arg4: memref<1x1x8xf32, #tpu.memory_space<vmem>>, %arg5: memref<1x1x8xf32, #tpu.memory_space<vmem>>) attributes {dimension_semantics = [#tpu.dimension_semantics<parallel>], iteration_bounds = array<i64: 1>, scalar_prefetch = 0 : i64, scratch_operands = 0 : i64, tpu.core_type = #tpu.core_type<tc>, window_params = [{transform_indices = @transform_0, window_bounds = array<i64: 8, 32>}, {transform_indices = @transform_1, window_bounds = array<i64: 8, 32>}, {transform_indices = @transform_2, window_bounds = array<i64: 8, 32>}, {transform_indices = @transform_3, window_bounds = array<i64: 1, 1, 8>}, {transform_indices = @transform_4, window_bounds = array<i64: 1, 1, 8>}]} {
    %c0 = arith.constant 0 : index
    %c0_0 = arith.constant 0 : index
    %0 = vector.load %arg1[%c0, %c0_0] : memref<8x32xf32, #tpu.memory_space<vmem>>, vector<8x32xf32>
    %c0_1 = arith.constant 0 : index
    %c0_2 = arith.constant 0 : index
    %1 = vector.load %arg2[%c0_1, %c0_2] : memref<8x32xf32, #tpu.memory_space<vmem>>, vector<8x32xf32>
    %c0_3 = arith.constant 0 : index
    %c0_4 = arith.constant 0 : index
    %2 = vector.load %arg3[%c0_3, %c0_4] : memref<8x32xf32, #tpu.memory_space<vmem>>, vector<8x32xf32>
    %3 = arith.subf %0, %1 : vector<8x32xf32>
    %4 = arith.subf %0, %2 : vector<8x32xf32>
    %5 = arith.mulf %3, %3 : vector<8x32xf32>
    %cst = arith.constant dense<0.000000e+00> : vector<8xf32>
    %6 = vector.multi_reduction <add>, %5, %cst [1] : vector<8x32xf32> to vector<8xf32>
    %7 = arith.mulf %4, %4 : vector<8x32xf32>
    %cst_5 = arith.constant dense<0.000000e+00> : vector<8xf32>
    %8 = vector.multi_reduction <add>, %7, %cst_5 [1] : vector<8x32xf32> to vector<8xf32>
    %9 = arith.mulf %3, %4 : vector<8x32xf32>
    %cst_6 = arith.constant dense<0.000000e+00> : vector<8xf32>
    %10 = vector.multi_reduction <add>, %9, %cst_6 [1] : vector<8x32xf32> to vector<8xf32>
    %11 = arith.mulf %6, %8 : vector<8xf32>
    %cst_7 = arith.constant 9.99999997E-7 : f32
    %cst_8 = arith.constant 9.99999997E-7 : f32
    %12 = arith.mulf %cst_7, %cst_8 : f32
    %13 = vector.broadcast %12 : f32 to vector<8xf32>
    %14 = arith.maximumf %11, %13 : vector<8xf32>
    %15 = math.rsqrt %14 : vector<8xf32>
    %16 = arith.subf %6, %8 : vector<8xf32>
    %17 = vector.shape_cast %16 : vector<8xf32> to vector<1x1x8xf32>
    %c0_9 = arith.constant 0 : index
    %c0_10 = arith.constant 0 : index
    %c0_11 = arith.constant 0 : index
    %18 = vector.load %arg4[%c0_9, %c0_10, %c0_11] : memref<1x1x8xf32, #tpu.memory_space<vmem>>, vector<1x1x8xf32>
    tpu.vector_store %arg4[%c0_9, %c0_10, %c0_11], %17 {strides = array<i32>} : memref<1x1x8xf32, #tpu.memory_space<vmem>>, vector<1x1x8xf32>,
    %19 = arith.mulf %10, %15 : vector<8xf32>
    %20 = vector.shape_cast %19 : vector<8xf32> to vector<1x1x8xf32>
    %c0_12 = arith.constant 0 : index
    %c0_13 = arith.constant 0 : index
    %c0_14 = arith.constant 0 : index
    %21 = vector.load %arg5[%c0_12, %c0_13, %c0_14] : memref<1x1x8xf32, #tpu.memory_space<vmem>>, vector<1x1x8xf32>
    tpu.vector_store %arg5[%c0_12, %c0_13, %c0_14], %20 {strides = array<i32>} : memref<1x1x8xf32, #tpu.memory_space<vmem>>, vector<1x1x8xf32>,
    return
  }
  func.func @transform_0(%arg0: i32) -> (i32, i32) {
    %c0_i32 = arith.constant 0 : i32
    %c0_i32_0 = arith.constant 0 : i32
    return %arg0, %c0_i32 : i32, i32
  }
  func.func @transform_1(%arg0: i32) -> (i32, i32) {
    %c0_i32 = arith.constant 0 : i32
    %c0_i32_0 = arith.constant 0 : i32
    return %arg0, %c0_i32 : i32, i32
  }
  func.func @transform_2(%arg0: i32) -> (i32, i32) {
    %c0_i32 = arith.constant 0 : i32
    %c0_i32_0 = arith.constant 0 : i32
    return %arg0, %c0_i32 : i32, i32
  }
  func.func @transform_3(%arg0: i32) -> (i32, i32, i32) {
    %c0_i32 = arith.constant 0 : i32
    %c0_i32_0 = arith.constant 0 : i32
    %c0_i32_1 = arith.constant 0 : i32
    return %arg0, %c0_i32, %c0_i32_0 : i32, i32, i32
  }
  func.func @transform_4(%arg0: i32) -> (i32, i32, i32) {
    %c0_i32 = arith.constant 0 : i32
    %c0_i32_0 = arith.constant 0 : i32
    %c0_i32_1 = arith.constant 0 : i32
    return %arg0, %c0_i32, %c0_i32_0 : i32, i32, i32
  }
}

</mosaic_0001>

<bundles_post_ra>
// kernel: tpu_custom_call.1
= control target key start
LH: loop header
LB: loop body
LE: loop exit
PB: predicated region body
PF: predicated region fallthrough
CT: control target
= control target key end

     0   :  { %10 = vsyncpa [#allocation3], 0  ;;  %s285_s0 = inlined_call_operand.hbm [shape: f32[8,32], index: 0, kind: input, shape index: {}]   ;;  %s286_s1 = inlined_call_operand.hbm [shape: f32[8,32], index: 1, kind: input, shape index: {}]   ;;  %s287_s2 = inlined_call_operand.hbm [shape: f32[8,32], index: 2, kind: input, shape index: {}]   ;;  %s288_s3 = inlined_call_operand.hbm [shape: f32[1,1,8], index: 3, kind: output, shape index: {0}]   ;;  %s289_s4 = inlined_call_operand.hbm [shape: f32[1,1,8], index: 4, kind: output, shape index: {1}]  }
   0x1   :  { %11 = vsyncpa [#allocation6], 0 }
   0x2   :  { %12 = vsyncpa [#allocation4], 0 }
   0x3   :  { %13 = vsyncpa [#allocation10], 0  ;;  %s238_s15 = smov [#allocation5]   ;;  %s239_s17 = smov [#allocation2]  }
   0x4   :  { %s30_s16 = sshll.u32 %s238_s15, 4  ;;  %s20_s18 = sshll.u32 %s239_s17, 4  ;;  %s31_s16 = int_to_ptr.vmem [resolvable:$true] %s30_s16  ;;  %s21_s18 = int_to_ptr.vmem [resolvable:$true] %s20_s18 }
   0x5   :  { %s138_s19 = scalar_lea.vmem %s31_s16, 128  ;;  %p143_p1 = scmp.lt.s32.totalorder %s31_s16, %s31_s16 }
   0x6   :  { %p139_p0 = scmp.ne.s32.totalorder %s31_s16, %s138_s19  ;;  %p144_p2 = scmp.lt.s32.totalorder %s138_s19, %s138_s19 }
   0x8   :  { %p145_p3 = por %p144_p2, %p143_p1 }
   0xa   :  { %p146_p4 = pnand %p145_p3, %p139_p0 }
   0xc   :  { %149 = shalt.err (!%p146_p4)
}
   0xd   :  { %33 = dma.hbm_to_vmem [thread:$0]  %s286_s1, 128, %s31_s16, [#allocation6]  }
   0xe   :  { %s158_s22 = scalar_lea.vmem %s21_s18, 128  ;;  %p163_p6 = scmp.lt.s32.totalorder %s21_s18, %s21_s18 }
   0xf   :  { %p159_p5 = scmp.ne.s32.totalorder %s21_s18, %s158_s22  ;;  %p164_p7 = scmp.lt.s32.totalorder %s158_s22, %s158_s22 }
  0x11   :  { %p165_p8 = por %p164_p7, %p163_p6 }
  0x13   :  { %p166_p9 = pnand %p165_p8, %p159_p5 }
  0x15   :  { %169 = shalt.err (!%p166_p9)
}
  0x16   :  { %23 = dma.hbm_to_vmem [thread:$0]  %s285_s0, 128, %s21_s18, [#allocation3]  }
  0x17   :  { %s240_s25 = smov [#allocation7]  }
  0x18   :  { %s40_s26 = sshll.u32 %s240_s25, 4  ;;  %s41_s26 = int_to_ptr.vmem [resolvable:$true] %s40_s26 }
  0x19   :  { %s178_s27 = scalar_lea.vmem %s41_s26, 128  ;;  %p183_p11 = scmp.lt.s32.totalorder %s41_s26, %s41_s26 }
  0x1a   :  { %p179_p10 = scmp.ne.s32.totalorder %s41_s26, %s178_s27  ;;  %p184_p12 = scmp.lt.s32.totalorder %s178_s27, %s178_s27 }
  0x1c   :  { %p185_p13 = por %p184_p12, %p183_p11 }
  0x1e   :  { %p186_p0 = pnand %p185_p13, %p179_p10 }
  0x20   :  { %189 = shalt.err (!%p186_p0)
}
  0x21   :  { %43 = dma.hbm_to_vmem [thread:$0]  %s287_s2, 128, %s41_s26, [#allocation6]  }
  0x22   :  { %230 = dma.done.wait [#allocation3], 128  }
  0x23   :  { %231 = vsyncadd [#allocation3], 4294967168 }
  0x24   :  { %232 = dma.done.wait [#allocation6], 256  }
  0x25   :  { %233 = vsyncadd [#allocation6], 4294967040  ;;  %v53_v0 = vld [vmem:[#allocation2] sm:$0xff]  ;;  %v54_v1 = vld [vmem:[#allocation5] sm:$0xff]  ;;  %vm59_vm0 = vcmask 261120   ;;  %v76_v11 = vlaneseq  ;;  %s241_s0 = smov [#allocation8]  }
  0x26   :  { %v55_v2 = vld [vmem:[#allocation7] sm:$0xff]  ;;  %v56_v3 = vsub.f32 %v53_v0, %v54_v1  ;;  %s99_s2 = sshll.u32 %s241_s0, 4  ;;  %vm83_vm1 = vcmask 57344   ;;  %s100_s2 = int_to_ptr.vmem [resolvable:$true] %s99_s2 }
  0x27   :  { %v57_v4 = vsub.f32 %v53_v0, %v55_v2  ;;  %v77_v12 = vand.u32 127, %v76_v11  ;;  %v79_v13 = vshrl.u32 %v76_v11, 7  ;;  %s190_s29 = scalar_lea.vmem %s100_s2, 16  ;;  %s194_s30 = scalar_lea.vmem %s100_s2, 32 }
  0x28   :  { %v58_v5 = vmul.f32 %v56_v3, %v56_v3  ;;  %p191_p1 = scmp.ne.s32.totalorder %s100_s2, %s190_s29  ;;  %p195_p2 = scmp.lt.s32.totalorder %s100_s2, %s100_s2 }
  0x29   :  { %v63_v6 = vmul.f32 %v57_v4, %v57_v4  ;;  %v67_v7 = vmul.f32 %v57_v4, %v56_v3  ;;  %v80_v15 = vsub.s32 %v77_v12, %v79_v13  ;;  %p196_p3 = scmp.lt.s32.totalorder %s194_s30, %s190_s29 }
  0x2a   :  { %v60_v8 = vsel %vm59_vm0, %v58_v5, 0.0 }
  0x2b   :  { %v68_v9 = vsel %vm59_vm0, %v67_v7, 0.0  ;;  %61 = vadd.xlane.f32.xlu0 %v60_v8  ;;  %v64_v10 = vsel %vm59_vm0, %v63_v6, 0.0  ;;  %p197_p4 = por %p196_p3, %p195_p2 }
  0x2c   :  { %69 = vadd.xlane.f32.xlu1 %v68_v9 }
  0x2d   :  { %p198_p5 = pnand %p197_p4, %p191_p1 }
  0x2f   :  { %65 = vadd.xlane.f32.xlu0 %v64_v10 }
  0xb4   :  { %v62_v14 = vpop.xlane.xlu0 %61 }
  0xb8   :  { %v66_v16 = vpop.xlane.xlu0 %65 }
  0xb9   :  { %v71_v17 = vmul.f32 %v66_v16, %v62_v14  ;;  %v74_v18 = vsub.f32 %v62_v14, %v66_v16 }
  0xbb   :  { %v72_v19 = vmax.f32 %v71_v17, 1e-12  ;;  %v81_v20 = vrot.slane %v74_v18, %v80_v15 }
  0xbd   :  { %128 = vrsqrt.f32 %v72_v19  ;;  %84 = vst.msk [vmem:[#allocation8] sm:$0x1] %vm83_vm1, %v81_v20 }
  0xbe   :  { %201 = shalt.err (!%p198_p5)
}
  0xbf   :  { %102 = dma.vmem_to_hbm [thread:$0]  %s100_s2, 16, %s288_s3, [#allocation4]   ;;  %v70_v21 = vpop.xlane.xlu1 %69 }
  0xc0   :  { %s242_s7 = smov [#allocation9]  }
  0xc1   :  { %s109_s8 = sshll.u32 %s242_s7, 4  ;;  %s110_s8 = int_to_ptr.vmem [resolvable:$true] %s109_s8 }
  0xc2   :  { %s210_s9 = scalar_lea.vmem %s110_s8, 16  ;;  %s214_s10 = scalar_lea.vmem %s110_s8, 32 }
  0xc3   :  { %p211_p6 = scmp.ne.s32.totalorder %s110_s8, %s210_s9  ;;  %p215_p7 = scmp.lt.s32.totalorder %s110_s8, %s110_s8 }
  0xc4   :  { %p216_p8 = scmp.lt.s32.totalorder %s214_s10, %s210_s9 }
  0xc6   :  { %p217_p9 = por %p216_p8, %p215_p7 }
  0xc8   :  { %p218_p10 = pnand %p217_p9, %p211_p6 }
  0xca   :  { %v129_v22 = vpop.eup %128 }
  0xcb   :  { %v85_v23 = vmul.f32 %v129_v22, %v70_v21 }
  0xcd   :  { %v90_v24 = vrot.slane %v85_v23, %v80_v15 }
  0xcf   :  { %92 = vst.msk [vmem:[#allocation9] sm:$0x1] %vm83_vm1, %v90_v24 }
  0xd0   :  { %221 = shalt.err (!%p218_p10)
}
  0xd1   :  { %112 = dma.vmem_to_hbm [thread:$0]  %s110_s8, 16, %s289_s4, [#allocation10]  }
  0xd2   :  { %234 = dma.done.wait [#allocation4], 16  }
  0xd3   :  { %235 = vsyncadd [#allocation4], 4294967280 }
  0xd4   :  { %236 = dma.done.wait [#allocation10], 16  }
  0xd5   :  { %237 = vsyncadd [#allocation10], 4294967280 }
  0xd6   :  { %119 = vsyncpa [#allocation3], 1 }
  0xd7   :  { %120 = vsyncpa [#allocation6], 1 }
  0xd8   :  { %121 = vsyncpa [#allocation4], 1 }
  0xd9   :  { %122 = vsyncpa [#allocation10], 1 }

</bundles_post_ra>
